<compile_context>
chip_gen: v7x
topology: tpu7x:2x2x1
jax: 0.10.0
libtpu: 0.0.40
codegen_flags: <defaults>
</compile_context>

<pallas_src>
import functools

import jax
import jax.numpy as jnp
from jax.experimental import pallas as pl
from jax.experimental.pallas import tpu as pltpu

_NEG = -1e30  # bias on padded logit lanes -> exp() == 0 in the softmax


def _round_up(x, m):
    return (x + m - 1) // m * m


def _rnn_seq_kernel(x_ref, h0_ref, wx_ref, wh_ref, b_ref,
                    out_ref, hN_ref, h_sc, *, h_pad):
    """One grid step == one RNN time step; h_sc (VMEM scratch) carries h."""
    t = pl.program_id(0)

    @pl.when(t == 0)
    def _():
        h_sc[...] = h0_ref[...]

    x = x_ref[0]                                   # (B_pad, I_pad), compute dtype
    h = h_sc[...]                                  # (B_pad, H_pad), f32 carry

    # Single fused GEMM: [i2h | i2o] output columns side by side, f32 accum.
    fused = (
        jnp.dot(x, wx_ref[...], preferred_element_type=jnp.float32)
        + jnp.dot(h.astype(wh_ref.dtype), wh_ref[...],
                  preferred_element_type=jnp.float32)
        + b_ref[...]
    )                                              # (B_pad, H_pad + O_pad)

    new_h = fused[:, :h_pad]
    logits = fused[:, h_pad:]

    # Numerically stable log-softmax over the lane axis (padded lanes ~ -1e30).
    m = jnp.max(logits, axis=-1, keepdims=True)
    shifted = logits - m
    lse = jnp.log(jnp.sum(jnp.exp(shifted), axis=-1, keepdims=True))
    out_ref[0] = (shifted - lse).astype(out_ref.dtype)

    h_sc[...] = new_h
    hN_ref[...] = new_h        # resident output block, flushed once at the end


def prepare_params(w_i2h, b_i2h, w_i2o, b_i2o, input_size,
                   compute_dtype=jnp.float32):
    """One-time repack of PyTorch-layout Linear weights: pre-transposed to
    (in, out), split into x-part / h-part, fused [i2h | i2o] along the output
    axis, and padded to 128-wide lanes."""
    H, D = w_i2h.shape
    O = w_i2o.shape[0]
    assert D == input_size + H

    I_pad = _round_up(input_size, 128)
    H_pad = _round_up(H, 128)
    O_pad = _round_up(O, 128)
    N_pad = H_pad + O_pad

    wx = jnp.zeros((I_pad, N_pad), jnp.float32)
    wx = wx.at[:input_size, :H].set(w_i2h[:, :input_size].T)
    wx = wx.at[:input_size, H_pad:H_pad + O].set(w_i2o[:, :input_size].T)

    wh = jnp.zeros((H_pad, N_pad), jnp.float32)
    wh = wh.at[:H, :H].set(w_i2h[:, input_size:].T)
    wh = wh.at[:H, H_pad:H_pad + O].set(w_i2o[:, input_size:].T)

    bias = jnp.full((1, N_pad), _NEG, jnp.float32)
    bias = bias.at[0, :H_pad].set(0.0)              # padded hidden lanes stay 0
    bias = bias.at[0, :H].set(b_i2h)
    bias = bias.at[0, H_pad:H_pad + O].set(b_i2o)

    return dict(
        wx=wx.astype(compute_dtype),
        wh=wh.astype(compute_dtype),
        bias=bias,                                  # bias/accum stay f32
        input_size=input_size, hidden_size=H, output_size=O,
        I_pad=I_pad, H_pad=H_pad, O_pad=O_pad,
    )


def rnn_sequence(x_seq, hidden0, params):
    """Run the full recurrence in ONE pallas_call.

    x_seq   : (T, B, input_size)
    hidden0 : (1, H) or (B, H)
    returns (log_probs (T, B, O) f32, final_hidden (B, H) f32)
    """
    T, B, I = x_seq.shape
    H, O = params["hidden_size"], params["output_size"]
    I_pad, H_pad, O_pad = params["I_pad"], params["H_pad"], params["O_pad"]
    N_pad = H_pad + O_pad
    B_pad = _round_up(max(B, 8), 8)
    compute_dtype = params["wx"].dtype

    # Pad once for the whole sequence (lane/sublane-dense tiles).
    x_p = jnp.zeros((T, B_pad, I_pad), compute_dtype)
    x_p = x_p.at[:, :B, :I].set(x_seq.astype(compute_dtype))
    h0 = jnp.broadcast_to(hidden0, (B, H)).astype(jnp.float32)
    h0_p = jnp.zeros((B_pad, H_pad), jnp.float32).at[:B, :H].set(h0)

    kernel = functools.partial(_rnn_seq_kernel, h_pad=H_pad)

    def resident(shape):
        return pl.BlockSpec(shape, lambda t: tuple(0 for _ in shape))

    out_seq, h_final = pl.pallas_call(
        kernel,
        out_shape=(
            jax.ShapeDtypeStruct((T, B_pad, O_pad), jnp.float32),
            jax.ShapeDtypeStruct((B_pad, H_pad), jnp.float32),
        ),
        grid=(T,),
        in_specs=[
            pl.BlockSpec((1, B_pad, I_pad), lambda t: (t, 0, 0)),  # x_t
            resident((B_pad, H_pad)),                              # h0
            resident((I_pad, N_pad)),                              # fused Wx
            resident((H_pad, N_pad)),                              # fused Wh
            resident((1, N_pad)),                                  # fused bias
        ],
        out_specs=(
            pl.BlockSpec((1, B_pad, O_pad), lambda t: (t, 0, 0)),  # log-probs_t
            resident((B_pad, H_pad)),                              # final hidden
        ),
        scratch_shapes=[pltpu.VMEM((B_pad, H_pad), jnp.float32)],  # hidden carry
        compiler_params=pltpu.CompilerParams(
            dimension_semantics=("arbitrary",)),   # recurrence axis is serial
    )(x_p, h0_p, params["wx"], params["wh"], params["bias"])

    return out_seq[:, :B, :O], h_final[:B, :H]


def rnn_forward(inp, hidden, params):
    """Pallas equivalent of RNN.forward (single step).

    inp    : (B, input_size)
    hidden : (1, H) or (B, H)
    returns (log_probs (B, output_size), new_hidden (B, hidden_size))
    """
    out_seq, new_hidden = rnn_sequence(inp[None], hidden, params)
    return out_seq[0], new_hidden


def init_params(key, input_size, hidden_size, output_size):
    """Deterministic init mimicking nn.Linear's U(-1/sqrt(fan_in), 1/sqrt(fan_in))."""
    D = input_size + hidden_size
    k1, k2, k3, k4 = jax.random.split(key, 4)
    bound = 1.0 / jnp.sqrt(D)
    w_i2h = jax.random.uniform(k1, (hidden_size, D), jnp.float32, -bound, bound)
    b_i2h = jax.random.uniform(k2, (hidden_size,), jnp.float32, -bound, bound)
    w_i2o = jax.random.uniform(k3, (output_size, D), jnp.float32, -bound, bound)
    b_i2o = jax.random.uniform(k4, (output_size,), jnp.float32, -bound, bound)
    return w_i2h, b_i2h, w_i2o, b_i2o


if __name__ == "__main__":
    input_size, hidden_size, output_size = 16, 32, 8
    batch, seq_len = 2, 8

    key = jax.random.PRNGKey(0)
    kx, kp = jax.random.split(key)

    w_i2h, b_i2h, w_i2o, b_i2o = init_params(kp, input_size, hidden_size,
                                             output_size)
    # TODO(synk): on v6e/v7x pass compute_dtype=jnp.bfloat16 here for the bf16
    # MXU path (accumulation + softmax stay f32 inside the kernel either way).
    params = prepare_params(w_i2h, b_i2h, w_i2o, b_i2o, input_size)

    x_seq = jax.random.normal(kx, (seq_len, batch, input_size), jnp.float32)
    hidden0 = jnp.zeros((1, hidden_size), jnp.float32)   # RNN.init_hidden()

    # Single step (matches RNN.forward) and fused full recurrence.
    log_probs, new_hidden = rnn_forward(x_seq[0], hidden0, params)
    seq_log_probs, final_hidden = rnn_sequence(x_seq, hidden0, params)
    jax.block_until_ready((log_probs, new_hidden, seq_log_probs, final_hidden))

    # Pure-JAX reference.
    def ref_step(x, h):
        comb = jnp.concatenate(
            [x, jnp.broadcast_to(h, (x.shape[0], hidden_size))], axis=1)
        hid = comb @ w_i2h.T + b_i2h
        out = jax.nn.log_softmax(comb @ w_i2o.T + b_i2o, axis=1)
        return out, hid

    ref_out0, ref_h1 = ref_step(x_seq[0], hidden0)
    ref_outs, h = [], hidden0
    for t in range(seq_len):
        o, h = ref_step(x_seq[t], h)
        ref_outs.append(o)
    ref_outs = jnp.stack(ref_outs)

    assert log_probs.shape == (batch, output_size)
    assert new_hidden.shape == (batch, hidden_size)
    assert seq_log_probs.shape == (seq_len, batch, output_size)
    assert final_hidden.shape == (batch, hidden_size)
    assert bool(jnp.all(jnp.abs(jnp.exp(log_probs).sum(axis=1) - 1.0) < 1e-4))
    assert float(jnp.max(jnp.abs(log_probs - ref_out0))) < 5e-4
    assert float(jnp.max(jnp.abs(new_hidden - ref_h1))) < 5e-4
    assert float(jnp.max(jnp.abs(seq_log_probs - ref_outs))) < 5e-4
    assert float(jnp.max(jnp.abs(final_hidden - h))) < 5e-4

    print("KERNEL_OK")
</pallas_src>

<mosaic_0001>
module attributes {stable_mosaic.version = 11 : i64} {
  func.func @_rnn_seq_kernel(%arg0: i32, %arg1: memref<1x8x128xf32, #tpu.memory_space<vmem>>, %arg2: memref<8x128xf32, #tpu.memory_space<vmem>>, %arg3: memref<128x256xf32, #tpu.memory_space<vmem>>, %arg4: memref<128x256xf32, #tpu.memory_space<vmem>>, %arg5: memref<1x256xf32, #tpu.memory_space<vmem>>, %arg6: memref<1x8x128xf32, #tpu.memory_space<vmem>>, %arg7: memref<8x128xf32, #tpu.memory_space<vmem>>, %arg8: memref<8x128xf32, #tpu.memory_space<vmem>>) attributes {dimension_semantics = [#tpu.dimension_semantics<arbitrary>], iteration_bounds = array<i64: 1>, scalar_prefetch = 0 : i64, scratch_operands = 1 : i64, tpu.core_type = #tpu.core_type<tc>, window_params = [{transform_indices = @transform_0, window_bounds = array<i64: 1, 8, 128>}, {pipeline_mode = #tpu.pipeline_mode<synchronous>, transform_indices = @transform_1, window_bounds = array<i64: 8, 128>}, {pipeline_mode = #tpu.pipeline_mode<synchronous>, transform_indices = @transform_2, window_bounds = array<i64: 128, 256>}, {pipeline_mode = #tpu.pipeline_mode<synchronous>, transform_indices = @transform_3, window_bounds = array<i64: 128, 256>}, {pipeline_mode = #tpu.pipeline_mode<synchronous>, transform_indices = @transform_4, window_bounds = array<i64: 1, 256>}, {transform_indices = @transform_5, window_bounds = array<i64: 1, 8, 128>}, {pipeline_mode = #tpu.pipeline_mode<synchronous>, transform_indices = @transform_6, window_bounds = array<i64: 8, 128>}]} {
    %c0_i32 = arith.constant 0 : i32
    %0 = arith.cmpi eq, %arg0, %c0_i32 : i32
    %1 = arith.extui %0 : i1 to i32
    %c0_i32_0 = arith.constant 0 : i32
    %2 = arith.cmpi ne, %1, %c0_i32_0 : i32
    scf.if %2 {
      %c0_21 = arith.constant 0 : index
      %c0_22 = arith.constant 0 : index
      %31 = vector.load %arg2[%c0_21, %c0_22] : memref<8x128xf32, #tpu.memory_space<vmem>>, vector<8x128xf32>
      %c0_23 = arith.constant 0 : index
      %c0_24 = arith.constant 0 : index
      %32 = vector.load %arg8[%c0_23, %c0_24] : memref<8x128xf32, #tpu.memory_space<vmem>>, vector<8x128xf32>
      tpu.vector_store %arg8[%c0_23, %c0_24], %31 {strides = array<i32>} : memref<8x128xf32, #tpu.memory_space<vmem>>, vector<8x128xf32>,
    } else {
    }
    %c0 = arith.constant 0 : index
    %c0_1 = arith.constant 0 : index
    %c0_2 = arith.constant 0 : index
    %3 = vector.load %arg1[%c0, %c0_1, %c0_2] : memref<1x8x128xf32, #tpu.memory_space<vmem>>, vector<1x8x128xf32>
    %4 = vector.shape_cast %3 : vector<1x8x128xf32> to vector<8x128xf32>
    %c0_3 = arith.constant 0 : index
    %c0_4 = arith.constant 0 : index
    %5 = vector.load %arg8[%c0_3, %c0_4] : memref<8x128xf32, #tpu.memory_space<vmem>>, vector<8x128xf32>
    %c0_5 = arith.constant 0 : index
    %c0_6 = arith.constant 0 : index
    %6 = vector.load %arg3[%c0_5, %c0_6] : memref<128x256xf32, #tpu.memory_space<vmem>>, vector<128x256xf32>
    %cst = arith.constant dense<0.000000e+00> : vector<8x256xf32>
    %7 = tpu.matmul %4, %6, %cst {dimension_numbers = #tpu.dot_dimension_numbers<[1], [0], [0], [1], [0, 0, 1, 1], [], []>} : vector<8x128xf32>, vector<128x256xf32>, vector<8x256xf32> -> vector<8x256xf32>
    %c0_7 = arith.constant 0 : index
    %c0_8 = arith.constant 0 : index
    %8 = vector.load %arg4[%c0_7, %c0_8] : memref<128x256xf32, #tpu.memory_space<vmem>>, vector<128x256xf32>
    %cst_9 = arith.constant dense<0.000000e+00> : vector<8x256xf32>
    %9 = tpu.matmul %5, %8, %cst_9 {dimension_numbers = #tpu.dot_dimension_numbers<[1], [0], [0], [1], [0, 0, 1, 1], [], []>} : vector<8x128xf32>, vector<128x256xf32>, vector<8x256xf32> -> vector<8x256xf32>
    %10 = arith.addf %7, %9 : vector<8x256xf32>
    %c0_10 = arith.constant 0 : index
    %c0_11 = arith.constant 0 : index
    %11 = vector.load %arg5[%c0_10, %c0_11] : memref<1x256xf32, #tpu.memory_space<vmem>>, vector<1x256xf32>
    %12 = vector.broadcast %11 : vector<1x256xf32> to vector<8x256xf32>
    %13 = arith.addf %10, %12 : vector<8x256xf32>
    %14 = vector.extract_strided_slice %13 {offsets = [0, 0], sizes = [8, 128], strides = [1, 1]} : vector<8x256xf32> to vector<8x128xf32>
    %15 = vector.extract_strided_slice %13 {offsets = [0, 128], sizes = [8, 128], strides = [1, 1]} : vector<8x256xf32> to vector<8x128xf32>
    %cst_12 = arith.constant dense<0xFF800000> : vector<8xf32>
    %16 = vector.multi_reduction <maximumf>, %15, %cst_12 [1] : vector<8x128xf32> to vector<8xf32>
    %17 = vector.shape_cast %16 : vector<8xf32> to vector<8x1xf32>
    %18 = vector.broadcast %17 : vector<8x1xf32> to vector<8x128xf32>
    %19 = arith.subf %15, %18 : vector<8x128xf32>
    %20 = math.exp %19 : vector<8x128xf32>
    %cst_13 = arith.constant dense<0.000000e+00> : vector<8xf32>
    %21 = vector.multi_reduction <add>, %20, %cst_13 [1] : vector<8x128xf32> to vector<8xf32>
    %22 = vector.shape_cast %21 : vector<8xf32> to vector<8x1xf32>
    %23 = math.log %22 : vector<8x1xf32>
    %24 = vector.broadcast %23 : vector<8x1xf32> to vector<8x128xf32>
    %25 = arith.subf %19, %24 : vector<8x128xf32>
    %c0_14 = arith.constant 0 : index
    %c0_15 = arith.constant 0 : index
    %c0_16 = arith.constant 0 : index
    %26 = vector.load %arg6[%c0_14, %c0_15, %c0_16] : memref<1x8x128xf32, #tpu.memory_space<vmem>>, vector<1x8x128xf32>
    %27 = vector.shape_cast %26 : vector<1x8x128xf32> to vector<8x128xf32>
    %28 = vector.shape_cast %25 : vector<8x128xf32> to vector<1x8x128xf32>
    tpu.vector_store %arg6[%c0_14, %c0_15, %c0_16], %28 {strides = array<i32>} : memref<1x8x128xf32, #tpu.memory_space<vmem>>, vector<1x8x128xf32>,
    %c0_17 = arith.constant 0 : index
    %c0_18 = arith.constant 0 : index
    %29 = vector.load %arg8[%c0_17, %c0_18] : memref<8x128xf32, #tpu.memory_space<vmem>>, vector<8x128xf32>
    tpu.vector_store %arg8[%c0_17, %c0_18], %14 {strides = array<i32>} : memref<8x128xf32, #tpu.memory_space<vmem>>, vector<8x128xf32>,
    %c0_19 = arith.constant 0 : index
    %c0_20 = arith.constant 0 : index
    %30 = vector.load %arg7[%c0_19, %c0_20] : memref<8x128xf32, #tpu.memory_space<vmem>>, vector<8x128xf32>
    tpu.vector_store %arg7[%c0_19, %c0_20], %14 {strides = array<i32>} : memref<8x128xf32, #tpu.memory_space<vmem>>, vector<8x128xf32>,
    return
  }
  func.func @transform_0(%arg0: i32) -> (i32, i32, i32) {
    %c0_i32 = arith.constant 0 : i32
    %c0_i32_0 = arith.constant 0 : i32
    %c0_i32_1 = arith.constant 0 : i32
    return %arg0, %c0_i32, %c0_i32_0 : i32, i32, i32
  }
  func.func @transform_1(%arg0: i32) -> (i32, i32) {
    %c0_i32 = arith.constant 0 : i32
    %c0_i32_0 = arith.constant 0 : i32
    %c0_i32_1 = arith.constant 0 : i32
    return %c0_i32, %c0_i32_0 : i32, i32
  }
  func.func @transform_2(%arg0: i32) -> (i32, i32) {
    %c0_i32 = arith.constant 0 : i32
    %c0_i32_0 = arith.constant 0 : i32
    %c0_i32_1 = arith.constant 0 : i32
    return %c0_i32, %c0_i32_0 : i32, i32
  }
  func.func @transform_3(%arg0: i32) -> (i32, i32) {
    %c0_i32 = arith.constant 0 : i32
    %c0_i32_0 = arith.constant 0 : i32
    %c0_i32_1 = arith.constant 0 : i32
    return %c0_i32, %c0_i32_0 : i32, i32
  }
  func.func @transform_4(%arg0: i32) -> (i32, i32) {
    %c0_i32 = arith.constant 0 : i32
    %c0_i32_0 = arith.constant 0 : i32
    %c0_i32_1 = arith.constant 0 : i32
    return %c0_i32, %c0_i32_0 : i32, i32
  }
  func.func @transform_5(%arg0: i32) -> (i32, i32, i32) {
    %c0_i32 = arith.constant 0 : i32
    %c0_i32_0 = arith.constant 0 : i32
    %c0_i32_1 = arith.constant 0 : i32
    return %arg0, %c0_i32, %c0_i32_0 : i32, i32, i32
  }
  func.func @transform_6(%arg0: i32) -> (i32, i32) {
    %c0_i32 = arith.constant 0 : i32
    %c0_i32_0 = arith.constant 0 : i32
    %c0_i32_1 = arith.constant 0 : i32
    return %c0_i32, %c0_i32_0 : i32, i32
  }
}

</mosaic_0001>

<bundles_post_ra>
// kernel: tpu_custom_call.1
= control target key start
LH: loop header
LB: loop body
LE: loop exit
PB: predicated region body
PF: predicated region fallthrough
CT: control target
= control target key end

     0   :  { %12 = vsyncpa [#allocation4], 0  ;;  %s687_s0 = inlined_call_operand.hbm [shape: f32[1,8,128], index: 0, kind: input, shape index: {}]   ;;  %s688_s1 = inlined_call_operand.hbm [shape: f32[8,128], index: 1, kind: input, shape index: {}]   ;;  %s689_s2 = inlined_call_operand.hbm [shape: f32[128,256], index: 2, kind: input, shape index: {}]   ;;  %s690_s3 = inlined_call_operand.hbm [shape: f32[128,256], index: 3, kind: input, shape index: {}]   ;;  %s691_s4 = inlined_call_operand.vmem [shape: f32[1,256], index: 4, kind: input, shape index: {}]   ;;  %s692_s5 = inlined_call_operand.hbm [shape: f32[1,8,128], index: 5, kind: output, shape index: {0}]   ;;  %s693_s6 = inlined_call_operand.hbm [shape: f32[8,128], index: 6, kind: output, shape index: {1}]  }
   0x1   :  { %13 = vsyncpa [#allocation7], 0 }
   0x2   :  { %14 = vsyncpa [#allocation10], 0 }
   0x3   :  { %15 = vsyncpa [#allocation5], 0 }
   0x4   :  { %16 = vsyncpa [#allocation13], 0  ;;  %s568_s21 = smov [#allocation6]   ;;  %s569_s23 = smov [#allocation3]  }
   0x5   :  { %s33_s22 = sshll.u32 %s568_s21, 4  ;;  %s23_s24 = sshll.u32 %s569_s23, 4  ;;  %s34_s22 = int_to_ptr.vmem [resolvable:$true] %s33_s22  ;;  %s24_s24 = int_to_ptr.vmem [resolvable:$true] %s23_s24 }
   0x6   :  { %s426_s27 = scalar_lea.hbm %s688_s1, 128 }
   0x7   :  { %p427_p0 = scmp.ne.s32.totalorder %s688_s1, %s426_s27  ;;  %p430_p1 = scmp.lt.u32.totalorder %s426_s27, %s688_s1 }
   0x9   :  { %p432_p2 = pnand %p430_p1, %p427_p0 }
   0xb   :  { %435 = shalt.err (!%p432_p2)
}
   0xc   :  { %s436_s8 = scalar_lea.vmem %s34_s22, 128  ;;  %p441_p4 = scmp.lt.s32.totalorder %s34_s22, %s34_s22 }
   0xd   :  { %p437_p3 = scmp.ne.s32.totalorder %s34_s22, %s436_s8  ;;  %p442_p5 = scmp.lt.s32.totalorder %s436_s8, %s436_s8 }
   0xf   :  { %p443_p6 = por %p442_p5, %p441_p4 }
  0x11   :  { %p444_p7 = pnand %p443_p6, %p437_p3 }
  0x13   :  { %447 = shalt.err (!%p444_p7)
}
  0x14   :  { %36 = dma.hbm_to_vmem [thread:$0]  %s688_s1, 128, %s34_s22, [#allocation7]  }
  0x15   :  { %s448_s13 = scalar_lea.hbm %s687_s0, 128 }
  0x16   :  { %p449_p8 = scmp.ne.s32.totalorder %s687_s0, %s448_s13  ;;  %p452_p9 = scmp.lt.u32.totalorder %s448_s13, %s687_s0 }
  0x18   :  { %p454_p10 = pnand %p452_p9, %p449_p8 }
  0x1a   :  { %457 = shalt.err (!%p454_p10)
}
  0x1b   :  { %s458_s18 = scalar_lea.vmem %s24_s24, 128  ;;  %p463_p12 = scmp.lt.s32.totalorder %s24_s24, %s24_s24 }
  0x1c   :  { %p459_p11 = scmp.ne.s32.totalorder %s24_s24, %s458_s18  ;;  %p464_p13 = scmp.lt.s32.totalorder %s458_s18, %s458_s18 }
  0x1e   :  { %p465_p0 = por %p464_p13, %p463_p12 }
  0x20   :  { %p466_p1 = pnand %p465_p0, %p459_p11 }
  0x22   :  { %469 = shalt.err (!%p466_p1)
}
  0x23   :  { %26 = dma.hbm_to_vmem [thread:$0]  %s687_s0, 128, %s24_s24, [#allocation4]  }
  0x24   :  { %s570_s20 = smov [#allocation8]   ;;  %s470_s25 = scalar_lea.hbm %s689_s2, 4096 }
  0x25   :  { %s42_s21 = sshll.u32 %s570_s20, 4  ;;  %p471_p2 = scmp.ne.s32.totalorder %s689_s2, %s470_s25  ;;  %s43_s21 = int_to_ptr.vmem [resolvable:$true] %s42_s21 }
  0x26   :  { %p474_p3 = scmp.lt.u32.totalorder %s470_s25, %s689_s2 }
  0x28   :  { %p476_p4 = pnand %p474_p3, %p471_p2 }
  0x2a   :  { %479 = shalt.err (!%p476_p4)
}
  0x2b   :  { %s480_s30 = scalar_lea.vmem %s43_s21, 4096  ;;  %p485_p6 = scmp.lt.s32.totalorder %s43_s21, %s43_s21 }
  0x2c   :  { %p481_p5 = scmp.ne.s32.totalorder %s43_s21, %s480_s30  ;;  %p486_p7 = scmp.lt.s32.totalorder %s480_s30, %s480_s30 }
  0x2e   :  { %p487_p8 = por %p486_p7, %p485_p6 }
  0x30   :  { %p488_p9 = pnand %p487_p8, %p481_p5 }
  0x32   :  { %491 = shalt.err (!%p488_p9)
}
  0x33   :  { %s571_s0 = smov 256   ;;  %s572_s24 = smov 16  }
  0x34   :  { %48 = dma.hbm_to_vmem [thread:$0]  %s689_s2, 4096, %s43_s21, [#allocation7], %s571_s0, %s571_s0, %s572_s24  }
  0x35   :  { %s573_s9 = smov [#allocation9]   ;;  %s492_s13 = scalar_lea.hbm %s690_s3, 4096 }
  0x36   :  { %s54_s10 = sshll.u32 %s573_s9, 4  ;;  %p493_p10 = scmp.ne.s32.totalorder %s690_s3, %s492_s13  ;;  %s55_s10 = int_to_ptr.vmem [resolvable:$true] %s54_s10 }
  0x37   :  { %p496_p11 = scmp.lt.u32.totalorder %s492_s13, %s690_s3 }
  0x39   :  { %p498_p12 = pnand %p496_p11, %p493_p10 }
  0x3b   :  { %501 = shalt.err (!%p498_p12)
}
  0x3c   :  { %s502_s18 = scalar_lea.vmem %s55_s10, 4096  ;;  %p507_p0 = scmp.lt.s32.totalorder %s55_s10, %s55_s10 }
  0x3d   :  { %p503_p13 = scmp.ne.s32.totalorder %s55_s10, %s502_s18  ;;  %p508_p1 = scmp.lt.s32.totalorder %s502_s18, %s502_s18 }
  0x3f   :  { %p509_p2 = por %p508_p1, %p507_p0 }
  0x41   :  { %p510_p3 = pnand %p509_p2, %p503_p13 }
  0x43   :  { %513 = shalt.err (!%p510_p3)
}
  0x44   :  { %60 = dma.hbm_to_vmem [thread:$0]  %s690_s3, 4096, %s55_s10, [#allocation10], %s571_s0, %s571_s0, %s572_s24  }
  0x45   :  { %558 = dma.done.wait [#allocation4], 128  }
  0x46   :  { %559 = vsyncadd [#allocation4], 4294967168 }
  0x47   :  { %560 = dma.done.wait [#allocation7], 4224  }
  0x48   :  { %561 = vsyncadd [#allocation7], 4294963072 }
  0x49   :  { %562 = dma.done.wait [#allocation10], 4096  }
  0x4a   :  { %563 = vsyncadd [#allocation10], 4294963200  ;;  %v574_v0 = vmov 0.0   ;;  %v116_v1 = vld [vmem:[#allocation9 + $0x8] sm:$0xff]  ;;  %v118_v2 = vld [vmem:[#allocation9 + $0x18] sm:$0xff] }
  0x4b   :  { %211 = vmatprep.mubr.f32.mxu1 %v574_v0  ;;  %282 = vmatprep.mubr.f32.mxu0 %v574_v0  ;;  %v84_v3 = vld [vmem:[#allocation8 + $0x8] sm:$0xff]  ;;  %v347_v4 = vpack.c.bf16 %v118_v2, %v116_v1  ;;  %v86_v5 = vld [vmem:[#allocation8 + $0x18] sm:$0xff]  ;;  %v115_v6 = vld [vmem:[#allocation9] sm:$0xff] }
  0x4c   :  { %v117_v7 = vld [vmem:[#allocation9 + $0x10] sm:$0xff]  ;;  %v379_v8 = vpack.c.bf16 %v86_v5, %v84_v3  ;;  %v83_v10 = vld [vmem:[#allocation8] sm:$0xff]  ;;  %v120_v12 = vld [vmem:[#allocation9 + $0x28] sm:$0xff] }
  0x4d   :  { %v349_v9 = vpack.c.bf16 %v117_v7, %v115_v6  ;;  %v85_v11 = vld [vmem:[#allocation8 + $0x10] sm:$0xff]  ;;  %348 = vmatprep.subr.bf16.mxu1 %v347_v4  ;;  %v122_v14 = vld [vmem:[#allocation9 + $0x38] sm:$0xff]  ;;  %v88_v15 = vld [vmem:[#allocation8 + $0x28] sm:$0xff] }
  0x4e   :  { %v381_v13 = vpack.c.bf16 %v85_v11, %v83_v10  ;;  %v90_v16 = vld [vmem:[#allocation8 + $0x38] sm:$0xff]  ;;  %380 = vmatprep.subr.bf16.mxu0 %v379_v8  ;;  %v351_v17 = vpack.c.bf16 %v122_v14, %v120_v12  ;;  %v119_v19 = vld [vmem:[#allocation9 + $0x20] sm:$0xff]  ;;  %v121_v20 = vld [vmem:[#allocation9 + $0x30] sm:$0xff] }
  0x4f   :  { %350 = vmatpush1.bf16.msra.mxu1 %v349_v9  ;;  %v383_v18 = vpack.c.bf16 %v90_v16, %v88_v15  ;;  %v87_v21 = vld [vmem:[#allocation8 + $0x20] sm:$0xff]  ;;  %v353_v22 = vpack.c.bf16 %v121_v20, %v119_v19  ;;  %v89_v23 = vld [vmem:[#allocation8 + $0x30] sm:$0xff]  ;;  %v124_v24 = vld [vmem:[#allocation9 + $0x48] sm:$0xff] }
  0x50   :  { %382 = vmatpush1.bf16.msra.mxu0 %v381_v13  ;;  %v126_v25 = vld [vmem:[#allocation9 + $0x58] sm:$0xff]  ;;  %352 = vmatprep.subr.bf16.mxu1 %v351_v17  ;;  %v385_v26 = vpack.c.bf16 %v89_v23, %v87_v21  ;;  %v92_v28 = vld [vmem:[#allocation8 + $0x48] sm:$0xff]  ;;  %v123_v30 = vld [vmem:[#allocation9 + $0x40] sm:$0xff] }
  0x51   :  { %384 = vmatprep.subr.bf16.mxu0 %v383_v18  ;;  %v355_v27 = vpack.c.bf16 %v126_v25, %v124_v24  ;;  %v94_v29 = vld [vmem:[#allocation8 + $0x58] sm:$0xff]  ;;  %v125_v32 = vld [vmem:[#allocation9 + $0x50] sm:$0xff]  ;;  %v91_v33 = vld [vmem:[#allocation8 + $0x40] sm:$0xff] }
  0x52   :  { %v387_v31 = vpack.c.bf16 %v94_v29, %v92_v28  ;;  %v93_v34 = vld [vmem:[#allocation8 + $0x50] sm:$0xff]  ;;  %v357_v35 = vpack.c.bf16 %v125_v32, %v123_v30  ;;  %v128_v36 = vld [vmem:[#allocation9 + $0x68] sm:$0xff]  ;;  %v130_v37 = vld [vmem:[#allocation9 + $0x78] sm:$0xff] }
  0x53   :  { %354 = vmatpush1.bf16.msra.mxu1 %v353_v22  ;;  %v96_v38 = vld [vmem:[#allocation8 + $0x68] sm:$0xff]  ;;  %v389_v39 = vpack.c.bf16 %v93_v34, %v91_v33  ;;  %v359_v40 = vpack.c.bf16 %v130_v37, %v128_v36  ;;  %v98_v41 = vld [vmem:[#allocation8 + $0x78] sm:$0xff]  ;;  %v127_v42 = vld [vmem:[#allocation9 + $0x60] sm:$0xff] }
  0x54   :  { %386 = vmatpush1.bf16.msra.mxu0 %v385_v26  ;;  %356 = vmatprep.subr.bf16.mxu1 %v355_v27  ;;  %v129_v43 = vld [vmem:[#allocation9 + $0x70] sm:$0xff]  ;;  %v391_v44 = vpack.c.bf16 %v98_v41, %v96_v38  ;;  %v95_v45 = vld [vmem:[#allocation8 + $0x60] sm:$0xff]  ;;  %v132_v47 = vld [vmem:[#allocation9 + $0x88] sm:$0xff] }
  0x55   :  { %388 = vmatprep.subr.bf16.mxu0 %v387_v31  ;;  %v97_v46 = vld [vmem:[#allocation8 + $0x70] sm:$0xff]  ;;  %v134_v48 = vld [vmem:[#allocation9 + $0x98] sm:$0xff]  ;;  %v100_v49 = vld [vmem:[#allocation8 + $0x88] sm:$0xff]  ;;  %v361_v51 = vpack.c.bf16 %v129_v43, %v127_v42 }
  0x56   :  { %v102_v50 = vld [vmem:[#allocation8 + $0x98] sm:$0xff]  ;;  %v393_v52 = vpack.c.bf16 %v97_v46, %v95_v45  ;;  %v363_v53 = vpack.c.bf16 %v134_v48, %v132_v47  ;;  %v131_v54 = vld [vmem:[#allocation9 + $0x80] sm:$0xff]  ;;  %v133_v55 = vld [vmem:[#allocation9 + $0x90] sm:$0xff] }
  0x57   :  { %358 = vmatpush1.bf16.msra.mxu1 %v357_v35  ;;  %v99_v56 = vld [vmem:[#allocation8 + $0x80] sm:$0xff]  ;;  %v395_v57 = vpack.c.bf16 %v102_v50, %v100_v49  ;;  %v101_v58 = vld [vmem:[#allocation8 + $0x90] sm:$0xff]  ;;  %v136_v59 = vld [vmem:[#allocation9 + $0xa8] sm:$0xff]  ;;  %v365_v63 = vpack.c.bf16 %v133_v55, %v131_v54  ;;  %v291_v35 = vlaneseq }
  0x58   :  { %390 = vmatpush1.bf16.msra.mxu0 %v389_v39  ;;  %360 = vmatprep.subr.bf16.mxu1 %v359_v40  ;;  %v138_v60 = vld [vmem:[#allocation9 + $0xb8] sm:$0xff]  ;;  %v104_v61 = vld [vmem:[#allocation8 + $0xa8] sm:$0xff]  ;;  %v397_v0 = vpack.c.bf16 %v101_v58, %v99_v56  ;;  %v135_v2 = vld [vmem:[#allocation9 + $0xa0] sm:$0xff] }
  0x59   :  { %392 = vmatprep.subr.bf16.mxu0 %v391_v44  ;;  %v106_v62 = vld [vmem:[#allocation8 + $0xb8] sm:$0xff]  ;;  %v367_v1 = vpack.c.bf16 %v138_v60, %v136_v59  ;;  %v137_v3 = vld [vmem:[#allocation9 + $0xb0] sm:$0xff]  ;;  %v103_v4 = vld [vmem:[#allocation8 + $0xa0] sm:$0xff]  ;;  %v292_v36 = vshrl.u32 %v291_v35, 7 }
  0x5a   :  { %v399_v5 = vpack.c.bf16 %v106_v62, %v104_v61  ;;  %v105_v6 = vld [vmem:[#allocation8 + $0xb0] sm:$0xff]  ;;  %v140_v7 = vld [vmem:[#allocation9 + $0xc8] sm:$0xff]  ;;  %v142_v8 = vld [vmem:[#allocation9 + $0xd8] sm:$0xff]  ;;  %v369_v11 = vpack.c.bf16 %v137_v3, %v135_v2 }
  0x5b   :  { %362 = vmatpush1.bf16.msra.mxu1 %v361_v51  ;;  %v108_v9 = vld [vmem:[#allocation8 + $0xc8] sm:$0xff]  ;;  %v110_v10 = vld [vmem:[#allocation8 + $0xd8] sm:$0xff]  ;;  %v401_v12 = vpack.c.bf16 %v105_v6, %v103_v4  ;;  %v371_v13 = vpack.c.bf16 %v142_v8, %v140_v7  ;;  %v139_v14 = vld [vmem:[#allocation9 + $0xc0] sm:$0xff]  ;;  %v293_v37 = vsub.s32 0, %v292_v36  ;;  %v297_v39 = vsub.s32 1, %v292_v36 }
  0x5c   :  { %394 = vmatpush1.bf16.msra.mxu0 %v393_v52  ;;  %364 = vmatprep.subr.bf16.mxu1 %v363_v53  ;;  %v141_v15 = vld [vmem:[#allocation9 + $0xd0] sm:$0xff]  ;;  %v107_v16 = vld [vmem:[#allocation8 + $0xc0] sm:$0xff]  ;;  %v403_v17 = vpack.c.bf16 %v110_v10, %v108_v9  ;;  %v144_v19 = vld [vmem:[#allocation9 + $0xe8] sm:$0xff] }
  0x5d   :  { %396 = vmatprep.subr.bf16.mxu0 %v395_v57  ;;  %v109_v18 = vld [vmem:[#allocation8 + $0xd0] sm:$0xff]  ;;  %v146_v20 = vld [vmem:[#allocation9 + $0xf8] sm:$0xff]  ;;  %v112_v21 = vld [vmem:[#allocation8 + $0xe8] sm:$0xff]  ;;  %v373_v23 = vpack.c.bf16 %v141_v15, %v139_v14 }
  0x5e   :  { %v114_v22 = vld [vmem:[#allocation8 + $0xf8] sm:$0xff]  ;;  %v405_v24 = vpack.c.bf16 %v109_v18, %v107_v16  ;;  %v375_v25 = vpack.c.bf16 %v146_v20, %v144_v19  ;;  %v143_v26 = vld [vmem:[#allocation9 + $0xe0] sm:$0xff]  ;;  %v145_v27 = vld [vmem:[#allocation9 + $0xf0] sm:$0xff] }
  0x5f   :  { %366 = vmatpush1.bf16.msra.mxu1 %v365_v63  ;;  %v407_v28 = vpack.c.bf16 %v114_v22, %v112_v21  ;;  %v111_v29 = vld [vmem:[#allocation8 + $0xe0] sm:$0xff]  ;;  %v113_v30 = vld [vmem:[#allocation8 + $0xf0] sm:$0xff]  ;;  %v377_v31 = vpack.c.bf16 %v145_v27, %v143_v26  ;;  %v79_v33 = vld [vmem:[#allocation6] sm:$0xff] }
  0x60   :  { %398 = vmatpush1.bf16.msra.mxu0 %v397_v0  ;;  %368 = vmatprep.subr.bf16.mxu1 %v367_v1  ;;  %v409_v32 = vpack.c.bf16 %v113_v30, %v111_v29  ;;  %v81_v34 = vld [vmem:[#allocation3] sm:$0xff] }
  0x61   :  { %400 = vmatprep.subr.bf16.mxu0 %v399_v5  ;;  %v289_v38 = vld [vmem:[%s691_s4] sm:$0x3]  ;;  %s575_s4 = smov [#allocation12]  }
  0x62   :  { %v294_v41 = vrot.slane %v289_v38, %v293_v37  ;;  %v298_v44 = vrot.slane %v289_v38, %v297_v39  ;;  %s332_s20 = sshll.u32 %s575_s4, 4  ;;  %s333_s20 = int_to_ptr.vmem [resolvable:$true] %s332_s20 }
  0x63   :  { %370 = vmatpush1.bf16.msra.mxu1 %v369_v11  ;;  %s514_s21 = scalar_lea.vmem %s333_s20, 128  ;;  %p519_p5 = scmp.lt.s32.totalorder %s333_s20, %s333_s20 }
  0x64   :  { %402 = vmatpush1.bf16.msra.mxu0 %v401_v12  ;;  %372 = vmatprep.subr.bf16.mxu1 %v371_v13  ;;  %p515_p4 = scmp.ne.s32.totalorder %s333_s20, %s514_s21  ;;  %p520_p6 = scmp.lt.s32.totalorder %s514_s21, %s514_s21 }
  0x65   :  { %404 = vmatprep.subr.bf16.mxu0 %v403_v17 }
  0x66   :  { %p521_p7 = por %p520_p6, %p519_p5 }
  0x67   :  { %374 = vmatpush1.bf16.msra.mxu1 %v373_v23 }
  0x68   :  { %406 = vmatpush1.bf16.msra.mxu0 %v405_v24  ;;  %376 = vmatprep.subr.bf16.mxu1 %v375_v25  ;;  %p522_p8 = pnand %p521_p7, %p515_p4 }
  0x69   :  { %408 = vmatprep.subr.bf16.mxu0 %v407_v28 }
  0x6b   :  { %378 = vmatpush1.bf16.msra.mxu1 %v377_v31 }
  0x6c   :  { %410 = vmatpush1.bf16.msra.mxu0 %v409_v32 }
  0x6e   :  { %212 = vmatmul.mubr.f32.vlgmr.msra.gmra.mrb[0].mxu1 %v79_v33 }
  0x6f   :  { %283 = vmatmul.mubr.f32.vlgmr.msra.gmra.mrb[0].mxu0 %v81_v34 }
 0x141   :  { %v213_v40 = vpop.f32.mrb[0].mxu1 }
 0x142   :  { %v284_v42 = vpop.f32.mrb[0].mxu0  ;;  %v215_v43 = vpop.f32.mrb[1].mxu1 }
 0x143   :  { %v285_v45 = vadd.f32 %v284_v42, %v213_v40  ;;  %v286_v46 = vpop.f32.mrb[1].mxu0 }
 0x144   :  { %v287_v47 = vadd.f32 %v286_v46, %v215_v43 }
 0x145   :  { %v301_v48 = vadd.f32 %v294_v41, %v285_v45 }
 0x146   :  { %v302_v49 = vadd.f32 %v298_v44, %v287_v47 }
 0x147   :  { %315 = vst [vmem:[#allocation12] sm:$0xff] %v301_v48 }
 0x148   :  { %303 = vmax.xlane.f32.xlu0 %v302_v49 }
 0x1d5   :  { %v304_v50 = vpop.xlane.xlu0 %303 }
 0x1d6   :  { %v305_v51 = vsub.f32 %v302_v49, %v304_v50 }
 0x1d8   :  { %v306_v52 = vmul.f32 1.442695, %v305_v51 }
 0x1da   :  { %422 = vpow2.f32 %v306_v52 }
 0x1e4   :  { %v423_v53 = vpop.eup %422 }
 0x1e5   :  { %308 = vadd.xlane.f32.xlu0 %v423_v53 }
 0x1e6   :  { %525 = shalt.err (!%p522_p8)
}
 0x1e7   :  { %s526_s25 = scalar_lea.hbm %s693_s6, 128 }
 0x1e8   :  { %p527_p9 = scmp.ne.s32.totalorder %s693_s6, %s526_s25  ;;  %p530_p10 = scmp.lt.u32.totalorder %s526_s25, %s693_s6 }
 0x1ea   :  { %p532_p11 = pnand %p530_p10, %p527_p9 }
 0x1ec   :  { %535 = shalt.err (!%p532_p11)
}
 0x1ed   :  { %335 = dma.vmem_to_hbm [thread:$0]  %s333_s20, 128, %s693_s6, [#allocation13]  }
 0x1ee   :  { %s576_s24 = smov [#allocation11]  }
 0x1ef   :  { %s322_s7 = sshll.u32 %s576_s24, 4  ;;  %s323_s7 = int_to_ptr.vmem [resolvable:$true] %s322_s7 }
 0x1f0   :  { %s536_s8 = scalar_lea.vmem %s323_s7, 128  ;;  %p541_p13 = scmp.lt.s32.totalorder %s323_s7, %s323_s7 }
 0x1f1   :  { %p537_p12 = scmp.ne.s32.totalorder %s323_s7, %s536_s8  ;;  %p542_p0 = scmp.lt.s32.totalorder %s536_s8, %s536_s8 }
 0x1f3   :  { %p543_p1 = por %p542_p0, %p541_p13 }
 0x1f5   :  { %p544_p2 = pnand %p543_p1, %p537_p12 }
 0x272   :  { %v309_v54 = vpop.xlane.xlu0 %308 }
 0x273   :  { %424 = vlog2.f32 %v309_v54 }
 0x27d   :  { %v425_v55 = vpop.eup %424 }
 0x27e   :  { %v311_v56 = vmul.f32 0.6931472, %v425_v55 }
 0x280   :  { %v312_v57 = vsub.f32 %v305_v51, %v311_v56 }
 0x282   :  { %313 = vst [vmem:[#allocation11] sm:$0xff] %v312_v57 }
 0x283   :  { %547 = shalt.err (!%p544_p2)
}
 0x284   :  { %s548_s6 = scalar_lea.hbm %s692_s5, 128 }
 0x285   :  { %p549_p3 = scmp.ne.s32.totalorder %s692_s5, %s548_s6  ;;  %p552_p4 = scmp.lt.u32.totalorder %s548_s6, %s692_s5 }
 0x287   :  { %p554_p5 = pnand %p552_p4, %p549_p3 }
 0x289   :  { %557 = shalt.err (!%p554_p5)
}
 0x28a   :  { %325 = dma.vmem_to_hbm [thread:$0]  %s323_s7, 128, %s692_s5, [#allocation5]  }
 0x28b   :  { %564 = dma.done.wait [#allocation5], 128  }
 0x28c   :  { %565 = vsyncadd [#allocation5], 4294967168 }
 0x28d   :  { %566 = dma.done.wait [#allocation13], 128  }
 0x28e   :  { %567 = vsyncadd [#allocation13], 4294967168 }
 0x28f   :  { %342 = vsyncpa [#allocation4], 1 }
 0x290   :  { %343 = vsyncpa [#allocation7], 1 }
 0x291   :  { %344 = vsyncpa [#allocation10], 1 }
 0x292   :  { %345 = vsyncpa [#allocation5], 1 }
 0x293   :  { %346 = vsyncpa [#allocation13], 1 }

</bundles_post_ra>
